<compile_context>
chip_gen: v7x
topology: tpu7x:2x2x1
jax: 0.10.0
libtpu: 0.0.40
codegen_flags: <defaults>
</compile_context>

<pallas_src>
import functools

import jax
import jax.numpy as jnp
from jax.experimental import pallas as pl
from jax.experimental.pallas import tpu as pltpu

LANE = 128
SUBLANE = 8
MAX_BM = 512          # largest batch tile (review: ~85% of HBM roofline vs 29% at 128)


def _round_up(x, m):
    return ((x + m - 1) // m) * m


def _policy_kernel(x_ref, w1_ref, b1_ref, w2_ref, b2_ref, w3_ref, b3_ref,
                   probs_ref, action_ref):
    x = x_ref[...]                                                  # [bm, S] f32
    h1 = jnp.tanh(
        jnp.dot(x, w1_ref[...], preferred_element_type=jnp.float32)
        + b1_ref[...])                                              # [bm, H]
    h2 = jnp.tanh(
        jnp.dot(h1, w2_ref[...], preferred_element_type=jnp.float32)
        + b2_ref[...])                                              # [bm, H]
    logits = (jnp.dot(h2, w3_ref[...], preferred_element_type=jnp.float32)
              + b3_ref[...])                                        # [bm, A_pad]

    # numerically-stable softmax over the lane-dense (padded) action axis.
    # Padded lanes carry a -1e30 bias so exp() underflows to exactly 0.
    m = jnp.max(logits, axis=-1, keepdims=True)
    e = jnp.exp(logits - m)
    denom = jnp.sum(e, axis=-1, keepdims=True)
    probs_ref[...] = e / denom            # exact divide: rows sum to 1 exactly-ish

    # in-kernel argmax on the f32 logits (first-max index == torch/np argmax).
    # Padded lanes never win (-1e30).  Rides the XLU; one narrow int32 store.
    a_pad = logits.shape[-1]
    lane_idx = jax.lax.broadcasted_iota(jnp.int32, logits.shape, dimension=1)
    action_ref[...] = jnp.min(
        jnp.where(logits == m, lane_idx, a_pad), axis=-1, keepdims=True)


def pad_policy_params(params):
    """One-time prep: cast to f32 and lane-pad w3/b3 to a multiple of 128.

    Hoisted out of the per-call path (perf review): at small B the forward is
    launch-bound and these pad ops were a double-digit % of call latency.
    """
    H = params["w2"].shape[1]
    A = params["w3"].shape[1]
    A_pad = _round_up(A, LANE)
    w3p = jnp.zeros((H, A_pad), jnp.float32).at[:, :A].set(
        params["w3"].astype(jnp.float32))
    b3p = jnp.full((1, A_pad), -1e30, jnp.float32).at[:, :A].set(
        params["b3"].astype(jnp.float32).reshape(1, A))
    return {
        "w1": params["w1"].astype(jnp.float32),
        "b1": params["b1"].astype(jnp.float32).reshape(1, -1),
        "w2": params["w2"].astype(jnp.float32),
        "b2": params["b2"].astype(jnp.float32).reshape(1, -1),
        "w3p": w3p,
        "b3p": b3p,
    }


@functools.partial(jax.jit, static_argnames=("num_actions", "deterministic"))
def hrl_agent_forward(state, padded_params, num_actions, deterministic=True):
    """Fused discrete policy forward.

    Returns (action_ids [B] int32, dist_params / probs [B, A] float32).
    The mapping action_id -> Transformation object / CentralizedOutput wrapper
    in BaseHRLAgent.forward is host-side bookkeeping, not numeric work.
    """
    if not deterministic:
        # TODO(synk): stochastic Categorical sampling (pltpu.prng_* + Gumbel)
        # is not kernelized; only the deterministic path is implemented.
        raise NotImplementedError("only deterministic=True is kernelized")

    B, S = state.shape
    H = padded_params["w1"].shape[1]
    A_pad = padded_params["w3p"].shape[1]
    A = num_actions

    # ---- batch tiling: sublane-aligned, capped at 512 rows per step ----------
    bm = min(MAX_BM, _round_up(B, SUBLANE))
    B_pad = _round_up(B, bm)
    # v7x: ensure >= 2 "parallel" grid steps when the batch allows it, so both
    # TensorCores get work (weights are ~22 KB, re-fetch per core is negligible).
    if B_pad // bm < 2 and B >= 2 * SUBLANE:
        bm = _round_up((B_pad + 1) // 2, SUBLANE)
        B_pad = _round_up(B, bm)
    grid = (B_pad // bm,)

    x = state.astype(jnp.float32)
    if B_pad != B:
        x = jnp.zeros((B_pad, S), jnp.float32).at[:B].set(x)

    flops = 2 * B_pad * (S * H + H * H + H * A_pad)
    transcendentals = B_pad * (2 * H + A_pad)                   # tanh, tanh, exp
    bytes_accessed = 4 * (B_pad * S + S * H + H * H + H * A_pad
                          + 2 * H + A_pad + B_pad * A_pad + B_pad)

    probs_full, action_full = pl.pallas_call(
        _policy_kernel,
        out_shape=(
            jax.ShapeDtypeStruct((B_pad, A_pad), jnp.float32),   # lane-dense probs
            jax.ShapeDtypeStruct((B_pad, 1), jnp.int32),         # argmax ids
        ),
        grid_spec=pltpu.PrefetchScalarGridSpec(
            num_scalar_prefetch=0,
            grid=grid,
            in_specs=[
                pl.BlockSpec((bm, S), lambda i: (i, 0)),         # state block
                pl.BlockSpec((S, H), lambda i: (0, 0)),          # w1 (resident)
                pl.BlockSpec((1, H), lambda i: (0, 0)),          # b1
                pl.BlockSpec((H, H), lambda i: (0, 0)),          # w2
                pl.BlockSpec((1, H), lambda i: (0, 0)),          # b2
                pl.BlockSpec((H, A_pad), lambda i: (0, 0)),      # w3 (pre-padded)
                pl.BlockSpec((1, A_pad), lambda i: (0, 0)),      # b3 (pre-padded)
            ],
            out_specs=(
                pl.BlockSpec((bm, A_pad), lambda i: (i, 0)),
                pl.BlockSpec((bm, 1), lambda i: (i, 0)),
            ),
        ),
        compiler_params=pltpu.CompilerParams(
            dimension_semantics=("parallel",)),
        cost_estimate=pl.CostEstimate(
            flops=flops,
            transcendentals=transcendentals,
            bytes_accessed=bytes_accessed),
    )(x, padded_params["w1"], padded_params["b1"],
      padded_params["w2"], padded_params["b2"],
      padded_params["w3p"], padded_params["b3p"])

    # Note: for very large B a consumer could take the padded slab directly and
    # skip this slice pass; the module's semantics call for a dense [B, A] output.
    probs = probs_full[:B, :A]
    action = action_full[:B, 0]
    return action, probs


def init_params(key, state_dim, hidden, num_actions):
    ks = jax.random.split(key, 3)
    scale1 = 1.0 / jnp.sqrt(state_dim)
    scale2 = 1.0 / jnp.sqrt(hidden)
    return {
        "w1": jax.random.normal(ks[0], (state_dim, hidden), jnp.float32) * scale1,
        "b1": jnp.zeros((1, hidden), jnp.float32),
        "w2": jax.random.normal(ks[1], (hidden, hidden), jnp.float32) * scale2,
        "b2": jnp.zeros((1, hidden), jnp.float32),
        "w3": jax.random.normal(ks[2], (hidden, num_actions), jnp.float32) * scale2,
        "b3": jnp.zeros((1, num_actions), jnp.float32),
    }


if __name__ == "__main__":
    key = jax.random.PRNGKey(0)
    k_state, k_params = jax.random.split(key)

    # batch >= 8 so all vreg sublanes are used and launch cost is amortized.
    B, S, H, A = 8, 16, 32, 8          # batch, state_dim, hidden, num_actions
    state = jax.random.normal(k_state, (B, S), jnp.float32)
    raw_params = init_params(k_params, S, H, A)
    params = pad_policy_params(raw_params)       # one-time, outside per-call path

    action, probs = hrl_agent_forward(state, params, num_actions=A)
    jax.block_until_ready((action, probs))

    # sanity: reference in plain JAX
    h1 = jnp.tanh(state @ raw_params["w1"] + raw_params["b1"])
    h2 = jnp.tanh(h1 @ raw_params["w2"] + raw_params["b2"])
    logits = h2 @ raw_params["w3"] + raw_params["b3"]
    ref_probs = jax.nn.softmax(logits, axis=-1)
    ref_action = jnp.argmax(logits, axis=-1)

    assert probs.shape == (B, A) and action.shape == (B,)
    assert jnp.allclose(probs, ref_probs, atol=1e-3), "probs mismatch"
    assert jnp.allclose(jnp.sum(probs, axis=-1), 1.0, atol=1e-3), "probs not normalized"
    assert jnp.all(action == ref_action.astype(jnp.int32)), "action mismatch"
    print("KERNEL_OK")
</pallas_src>

<mosaic_0001>
module attributes {stable_mosaic.version = 11 : i64} {
  func.func @_policy_kernel(%arg0: i32, %arg1: memref<8x16xf32, #tpu.memory_space<vmem>>, %arg2: memref<16x32xf32, #tpu.memory_space<vmem>>, %arg3: memref<1x32xf32, #tpu.memory_space<vmem>>, %arg4: memref<32x32xf32, #tpu.memory_space<vmem>>, %arg5: memref<1x32xf32, #tpu.memory_space<vmem>>, %arg6: memref<32x128xf32, #tpu.memory_space<vmem>>, %arg7: memref<1x128xf32, #tpu.memory_space<vmem>>, %arg8: memref<8x128xf32, #tpu.memory_space<vmem>>, %arg9: memref<8x1xi32, #tpu.memory_space<vmem>>) attributes {dimension_semantics = [#tpu.dimension_semantics<parallel>], iteration_bounds = array<i64: 1>, scalar_prefetch = 0 : i64, scratch_operands = 0 : i64, tpu.core_type = #tpu.core_type<tc>, window_params = [{transform_indices = @transform_0, window_bounds = array<i64: 8, 16>}, {pipeline_mode = #tpu.pipeline_mode<synchronous>, transform_indices = @transform_1, window_bounds = array<i64: 16, 32>}, {pipeline_mode = #tpu.pipeline_mode<synchronous>, transform_indices = @transform_2, window_bounds = array<i64: 1, 32>}, {pipeline_mode = #tpu.pipeline_mode<synchronous>, transform_indices = @transform_3, window_bounds = array<i64: 32, 32>}, {pipeline_mode = #tpu.pipeline_mode<synchronous>, transform_indices = @transform_4, window_bounds = array<i64: 1, 32>}, {pipeline_mode = #tpu.pipeline_mode<synchronous>, transform_indices = @transform_5, window_bounds = array<i64: 32, 128>}, {pipeline_mode = #tpu.pipeline_mode<synchronous>, transform_indices = @transform_6, window_bounds = array<i64: 1, 128>}, {transform_indices = @transform_7, window_bounds = array<i64: 8, 128>}, {transform_indices = @transform_8, window_bounds = array<i64: 8, 1>}]} {
    %c0 = arith.constant 0 : index
    %c0_0 = arith.constant 0 : index
    %0 = vector.load %arg1[%c0, %c0_0] : memref<8x16xf32, #tpu.memory_space<vmem>>, vector<8x16xf32>
    %c0_1 = arith.constant 0 : index
    %c0_2 = arith.constant 0 : index
    %1 = vector.load %arg2[%c0_1, %c0_2] : memref<16x32xf32, #tpu.memory_space<vmem>>, vector<16x32xf32>
    %cst = arith.constant dense<0.000000e+00> : vector<8x32xf32>
    %2 = tpu.matmul %0, %1, %cst {dimension_numbers = #tpu.dot_dimension_numbers<[1], [0], [0], [1], [0, 0, 1, 1], [], []>} : vector<8x16xf32>, vector<16x32xf32>, vector<8x32xf32> -> vector<8x32xf32>
    %c0_3 = arith.constant 0 : index
    %c0_4 = arith.constant 0 : index
    %3 = vector.load %arg3[%c0_3, %c0_4] : memref<1x32xf32, #tpu.memory_space<vmem>>, vector<1x32xf32>
    %4 = vector.broadcast %3 : vector<1x32xf32> to vector<8x32xf32>
    %5 = arith.addf %2, %4 : vector<8x32xf32>
    %6 = math.tanh %5 : vector<8x32xf32>
    %c0_5 = arith.constant 0 : index
    %c0_6 = arith.constant 0 : index
    %7 = vector.load %arg4[%c0_5, %c0_6] : memref<32x32xf32, #tpu.memory_space<vmem>>, vector<32x32xf32>
    %cst_7 = arith.constant dense<0.000000e+00> : vector<8x32xf32>
    %8 = tpu.matmul %6, %7, %cst_7 {dimension_numbers = #tpu.dot_dimension_numbers<[1], [0], [0], [1], [0, 0, 1, 1], [], []>} : vector<8x32xf32>, vector<32x32xf32>, vector<8x32xf32> -> vector<8x32xf32>
    %c0_8 = arith.constant 0 : index
    %c0_9 = arith.constant 0 : index
    %9 = vector.load %arg5[%c0_8, %c0_9] : memref<1x32xf32, #tpu.memory_space<vmem>>, vector<1x32xf32>
    %10 = vector.broadcast %9 : vector<1x32xf32> to vector<8x32xf32>
    %11 = arith.addf %8, %10 : vector<8x32xf32>
    %12 = math.tanh %11 : vector<8x32xf32>
    %c0_10 = arith.constant 0 : index
    %c0_11 = arith.constant 0 : index
    %13 = vector.load %arg6[%c0_10, %c0_11] : memref<32x128xf32, #tpu.memory_space<vmem>>, vector<32x128xf32>
    %cst_12 = arith.constant dense<0.000000e+00> : vector<8x128xf32>
    %14 = tpu.matmul %12, %13, %cst_12 {dimension_numbers = #tpu.dot_dimension_numbers<[1], [0], [0], [1], [0, 0, 1, 1], [], []>} : vector<8x32xf32>, vector<32x128xf32>, vector<8x128xf32> -> vector<8x128xf32>
    %c0_13 = arith.constant 0 : index
    %c0_14 = arith.constant 0 : index
    %15 = vector.load %arg7[%c0_13, %c0_14] : memref<1x128xf32, #tpu.memory_space<vmem>>, vector<1x128xf32>
    %16 = vector.broadcast %15 : vector<1x128xf32> to vector<8x128xf32>
    %17 = arith.addf %14, %16 : vector<8x128xf32>
    %cst_15 = arith.constant dense<0xFF800000> : vector<8xf32>
    %18 = vector.multi_reduction <maximumf>, %17, %cst_15 [1] : vector<8x128xf32> to vector<8xf32>
    %19 = vector.shape_cast %18 : vector<8xf32> to vector<8x1xf32>
    %20 = vector.broadcast %19 : vector<8x1xf32> to vector<8x128xf32>
    %21 = arith.subf %17, %20 : vector<8x128xf32>
    %22 = math.exp %21 : vector<8x128xf32>
    %cst_16 = arith.constant dense<0.000000e+00> : vector<8xf32>
    %23 = vector.multi_reduction <add>, %22, %cst_16 [1] : vector<8x128xf32> to vector<8xf32>
    %24 = vector.shape_cast %23 : vector<8xf32> to vector<8x1xf32>
    %25 = vector.broadcast %24 : vector<8x1xf32> to vector<8x128xf32>
    %26 = arith.divf %22, %25 : vector<8x128xf32>
    %c0_17 = arith.constant 0 : index
    %c0_18 = arith.constant 0 : index
    %27 = vector.load %arg8[%c0_17, %c0_18] : memref<8x128xf32, #tpu.memory_space<vmem>>, vector<8x128xf32>
    tpu.vector_store %arg8[%c0_17, %c0_18], %26 {strides = array<i32>} : memref<8x128xf32, #tpu.memory_space<vmem>>, vector<8x128xf32>,
    %28 = tpu.iota {dimensions = array<i32: 1>} : vector<8x128xi32>
    %29 = vector.broadcast %19 : vector<8x1xf32> to vector<8x128xf32>
    %30 = arith.cmpf oeq, %17, %29 : vector<8x128xf32>
    %c128_i32 = arith.constant 128 : i32
    %31 = vector.broadcast %c128_i32 : i32 to vector<8x128xi32>
    %32 = arith.select %30, %28, %31 : vector<8x128xi1>, vector<8x128xi32>
    %cst_19 = arith.constant dense<2147483647> : vector<8xi32>
    %33 = vector.multi_reduction <minsi>, %32, %cst_19 [1] : vector<8x128xi32> to vector<8xi32>
    %34 = vector.shape_cast %33 : vector<8xi32> to vector<8x1xi32>
    %c0_20 = arith.constant 0 : index
    %c0_21 = arith.constant 0 : index
    %35 = vector.load %arg9[%c0_20, %c0_21] : memref<8x1xi32, #tpu.memory_space<vmem>>, vector<8x1xi32>
    tpu.vector_store %arg9[%c0_20, %c0_21], %34 {strides = array<i32>} : memref<8x1xi32, #tpu.memory_space<vmem>>, vector<8x1xi32>,
    return
  }
  func.func @transform_0(%arg0: i32) -> (i32, i32) {
    %c0_i32 = arith.constant 0 : i32
    %c0_i32_0 = arith.constant 0 : i32
    return %arg0, %c0_i32 : i32, i32
  }
  func.func @transform_1(%arg0: i32) -> (i32, i32) {
    %c0_i32 = arith.constant 0 : i32
    %c0_i32_0 = arith.constant 0 : i32
    %c0_i32_1 = arith.constant 0 : i32
    return %c0_i32, %c0_i32_0 : i32, i32
  }
  func.func @transform_2(%arg0: i32) -> (i32, i32) {
    %c0_i32 = arith.constant 0 : i32
    %c0_i32_0 = arith.constant 0 : i32
    %c0_i32_1 = arith.constant 0 : i32
    return %c0_i32, %c0_i32_0 : i32, i32
  }
  func.func @transform_3(%arg0: i32) -> (i32, i32) {
    %c0_i32 = arith.constant 0 : i32
    %c0_i32_0 = arith.constant 0 : i32
    %c0_i32_1 = arith.constant 0 : i32
    return %c0_i32, %c0_i32_0 : i32, i32
  }
  func.func @transform_4(%arg0: i32) -> (i32, i32) {
    %c0_i32 = arith.constant 0 : i32
    %c0_i32_0 = arith.constant 0 : i32
    %c0_i32_1 = arith.constant 0 : i32
    return %c0_i32, %c0_i32_0 : i32, i32
  }
  func.func @transform_5(%arg0: i32) -> (i32, i32) {
    %c0_i32 = arith.constant 0 : i32
    %c0_i32_0 = arith.constant 0 : i32
    %c0_i32_1 = arith.constant 0 : i32
    return %c0_i32, %c0_i32_0 : i32, i32
  }
  func.func @transform_6(%arg0: i32) -> (i32, i32) {
    %c0_i32 = arith.constant 0 : i32
    %c0_i32_0 = arith.constant 0 : i32
    %c0_i32_1 = arith.constant 0 : i32
    return %c0_i32, %c0_i32_0 : i32, i32
  }
  func.func @transform_7(%arg0: i32) -> (i32, i32) {
    %c0_i32 = arith.constant 0 : i32
    %c0_i32_0 = arith.constant 0 : i32
    return %arg0, %c0_i32 : i32, i32
  }
  func.func @transform_8(%arg0: i32) -> (i32, i32) {
    %c0_i32 = arith.constant 0 : i32
    %c0_i32_0 = arith.constant 0 : i32
    return %arg0, %c0_i32 : i32, i32
  }
}

</mosaic_0001>

<bundles_post_ra>
// kernel: hrl_agent_forward.1
= control target key start
LH: loop header
LB: loop body
LE: loop exit
PB: predicated region body
PF: predicated region fallthrough
CT: control target
= control target key end

     0   :  { %14 = vsyncpa [#allocation3], 0  ;;  %s725_s0 = inlined_call_operand.hbm [shape: f32[8,16], index: 0, kind: input, shape index: {}]   ;;  %s726_s1 = inlined_call_operand.hbm [shape: f32[16,32], index: 1, kind: input, shape index: {}]   ;;  %s727_s2 = inlined_call_operand.vmem [shape: f32[1,32], index: 2, kind: input, shape index: {}]   ;;  %s728_s3 = inlined_call_operand.hbm [shape: f32[32,32], index: 3, kind: input, shape index: {}]   ;;  %s729_s4 = inlined_call_operand.vmem [shape: f32[1,32], index: 4, kind: input, shape index: {}]   ;;  %s730_s5 = inlined_call_operand.hbm [shape: f32[32,128], index: 5, kind: input, shape index: {}]   ;;  %s731_s6 = inlined_call_operand.vmem [shape: f32[1,128], index: 6, kind: input, shape index: {}]   ;;  %s732_s7 = inlined_call_operand.hbm [shape: f32[8,128], index: 7, kind: output, shape index: {0}]   ;;  %s733_s8 = inlined_call_operand.vmem [shape: s32[8,1], index: 8, kind: output, shape index: {1}]  }
   0x1   :  { %15 = vsyncpa [#allocation6], 0 }
   0x2   :  { %16 = vsyncpa [#allocation9], 0 }
   0x3   :  { %17 = vsyncpa [#allocation4], 0  ;;  %s587_s27 = smov [#allocation5]   ;;  %s469_s9 = scalar_lea.hbm %s726_s1, 256 }
   0x4   :  { %s33_s28 = sshll.u32 %s587_s27, 4  ;;  %p470_p0 = scmp.ne.s32.totalorder %s726_s1, %s469_s9  ;;  %s34_s28 = int_to_ptr.vmem [resolvable:$true] %s33_s28 }
   0x5   :  { %p473_p1 = scmp.lt.u32.totalorder %s469_s9, %s726_s1 }
   0x7   :  { %p475_p2 = pnand %p473_p1, %p470_p0 }
   0x9   :  { %478 = shalt.err (!%p475_p2)
}
   0xa   :  { %s479_s14 = scalar_lea.vmem %s34_s28, 256  ;;  %p484_p4 = scmp.lt.s32.totalorder %s34_s28, %s34_s28 }
   0xb   :  { %p480_p3 = scmp.ne.s32.totalorder %s34_s28, %s479_s14  ;;  %p485_p5 = scmp.lt.s32.totalorder %s479_s14, %s479_s14 }
   0xd   :  { %p486_p6 = por %p485_p5, %p484_p4 }
   0xf   :  { %p487_p7 = pnand %p486_p6, %p480_p3 }
  0x11   :  { %490 = shalt.err (!%p487_p7)
}
  0x12   :  { %s588_s15 = smov 128   ;;  %s589_s16 = smov 8  }
  0x13   :  { %39 = dma.hbm_to_vmem [thread:$0]  %s726_s1, 256, %s34_s28, [#allocation6], %s588_s15, %s588_s15, %s589_s16  }
  0x14   :  { %s590_s19 = smov [#allocation2]   ;;  %s591_s21 = smov [#allocation7]  }
  0x15   :  { %s24_s20 = sshll.u32 %s590_s19, 4  ;;  %s47_s22 = sshll.u32 %s591_s21, 4  ;;  %s25_s20 = int_to_ptr.vmem [resolvable:$true] %s24_s20  ;;  %s48_s22 = int_to_ptr.vmem [resolvable:$true] %s47_s22 }
  0x16   :  { %s491_s25 = scalar_lea.hbm %s725_s0, 128 }
  0x17   :  { %p492_p8 = scmp.ne.s32.totalorder %s725_s0, %s491_s25  ;;  %p495_p9 = scmp.lt.u32.totalorder %s491_s25, %s725_s0 }
  0x19   :  { %p497_p10 = pnand %p495_p9, %p492_p8 }
  0x1b   :  { %500 = shalt.err (!%p497_p10)
}
  0x1c   :  { %s501_s1 = scalar_lea.vmem %s25_s20, 128  ;;  %p506_p12 = scmp.lt.s32.totalorder %s25_s20, %s25_s20 }
  0x1d   :  { %p502_p11 = scmp.ne.s32.totalorder %s25_s20, %s501_s1  ;;  %p507_p13 = scmp.lt.s32.totalorder %s501_s1, %s501_s1 }
  0x1f   :  { %p508_p0 = por %p507_p13, %p506_p12 }
  0x21   :  { %p509_p1 = pnand %p508_p0, %p502_p11 }
  0x23   :  { %512 = shalt.err (!%p509_p1)
}
  0x24   :  { %27 = dma.hbm_to_vmem [thread:$0]  %s725_s0, 128, %s25_s20, [#allocation3]  }
  0x25   :  { %s513_s12 = scalar_lea.hbm %s728_s3, 512 }
  0x26   :  { %p514_p2 = scmp.ne.s32.totalorder %s728_s3, %s513_s12  ;;  %p517_p3 = scmp.lt.u32.totalorder %s513_s12, %s728_s3 }
  0x28   :  { %p519_p4 = pnand %p517_p3, %p514_p2 }
  0x2a   :  { %522 = shalt.err (!%p519_p4)
}
  0x2b   :  { %s523_s19 = scalar_lea.vmem %s48_s22, 512  ;;  %p528_p6 = scmp.lt.s32.totalorder %s48_s22, %s48_s22 }
  0x2c   :  { %p524_p5 = scmp.ne.s32.totalorder %s48_s22, %s523_s19  ;;  %p529_p7 = scmp.lt.s32.totalorder %s523_s19, %s523_s19 }
  0x2e   :  { %p530_p8 = por %p529_p7, %p528_p6 }
  0x30   :  { %p531_p9 = pnand %p530_p8, %p524_p5 }
  0x32   :  { %534 = shalt.err (!%p531_p9)
}
  0x33   :  { %53 = dma.hbm_to_vmem [thread:$0]  %s728_s3, 512, %s48_s22, [#allocation6], %s588_s15, %s588_s15, %s589_s16  }
  0x34   :  { %s592_s21 = smov [#allocation8]   ;;  %s535_s26 = scalar_lea.hbm %s730_s5, 512 }
  0x35   :  { %s61_s23 = sshll.u32 %s592_s21, 4  ;;  %p536_p10 = scmp.ne.s32.totalorder %s730_s5, %s535_s26  ;;  %s62_s23 = int_to_ptr.vmem [resolvable:$true] %s61_s23 }
  0x36   :  { %p539_p11 = scmp.lt.u32.totalorder %s535_s26, %s730_s5 }
  0x38   :  { %p541_p12 = pnand %p539_p11, %p536_p10 }
  0x3a   :  { %544 = shalt.err (!%p541_p12)
}
  0x3b   :  { %s545_s28 = scalar_lea.vmem %s62_s23, 512  ;;  %p550_p0 = scmp.lt.s32.totalorder %s62_s23, %s62_s23 }
  0x3c   :  { %p546_p13 = scmp.ne.s32.totalorder %s62_s23, %s545_s28  ;;  %p551_p1 = scmp.lt.s32.totalorder %s545_s28, %s545_s28 }
  0x3e   :  { %p552_p2 = por %p551_p1, %p550_p0 }
  0x40   :  { %p553_p3 = pnand %p552_p2, %p546_p13 }
  0x42   :  { %556 = shalt.err (!%p553_p3)
}
  0x43   :  { %67 = dma.hbm_to_vmem [thread:$0]  %s730_s5, 512, %s62_s23, [#allocation9], %s588_s15, %s588_s15, %s589_s16  }
  0x44   :  { %579 = dma.done.wait [#allocation3], 128  }
  0x45   :  { %580 = vsyncadd [#allocation3], 4294967168 }
  0x46   :  { %581 = dma.done.wait [#allocation6], 768  }
  0x47   :  { %582 = vsyncadd [#allocation6], 4294966528 }
  0x48   :  { %583 = dma.done.wait [#allocation9], 512  }
  0x49   :  { %584 = vsyncadd [#allocation9], 4294966784  ;;  %v593_v0 = vmov 0.0|0.0   ;;  %vm594_vm0 = vmmov 0   ;;  %v595_v1 = vmov 0.0   ;;  %v83_v2 = vld [vmem:[#allocation5] sm:$0xff]  ;;  %v347_v32 = vlaneseq }
  0x4a   :  { %436 = vmatprep.subr.bf16.mxu0 %v593_v0  ;;  %411 = vmatprep.mubr.msk.f32.mxu0 %vm594_vm0, %v595_v1  ;;  %v84_v3 = vld [vmem:[#allocation5 + $0x8] sm:$0xff]  ;;  %v82_v5 = vld [vmem:[#allocation2] sm:$0xff]  ;;  %vm92_vm1 = vcmask 130048   ;;  %v167_v6 = vld [vmem:[#allocation7] sm:$0xff]  ;;  %vm178_vm2 = vcmask 261120  }
  0x4b   :  { %439 = vmatprep.subr.bf16.mxu1 %v593_v0  ;;  %422 = vmatprep.mubr.msk.f32.mxu1 %vm594_vm0, %v595_v1  ;;  %v437_v4 = vpack.c.bf16 %v84_v3, %v83_v2  ;;  %v168_v7 = vld [vmem:[#allocation7 + $0x8] sm:$0xff]  ;;  %v169_v8 = vld [vmem:[#allocation7 + $0x10] sm:$0xff]  ;;  %v170_v10 = vld [vmem:[#allocation7 + $0x18] sm:$0xff]  ;;  %v348_v33 = vand.u32 127, %v347_v32 }
  0x4c   :  { %v440_v9 = vpack.c.bf16 %v168_v7, %v167_v6  ;;  %v443_v11 = vpack.c.bf16 %v170_v10, %v169_v8  ;;  %v388_v12 = vld [vmem:[%s727_s2] ss:$0 sm:$0xff]  ;;  %v253_v17 = vld [vmem:[#allocation8] sm:$0xff]  ;;  %v255_v19 = vld [vmem:[#allocation8 + $0x10] sm:$0xff] }
  0x4d   :  { %438 = vmatpush3.bf16.msra.mxu0 %v437_v4  ;;  %v254_v18 = vld [vmem:[#allocation8 + $0x8] sm:$0xff]  ;;  %v256_v21 = vld [vmem:[#allocation8 + $0x18] sm:$0xff] }
  0x4e   :  { %445 = vmatprep.subr.bf16.mxu0 %v593_v0  ;;  %441 = vmatpush3.bf16.msra.mxu1 %v440_v9  ;;  %v446_v20 = vpack.c.bf16 %v254_v18, %v253_v17  ;;  %v449_v22 = vpack.c.bf16 %v256_v21, %v255_v19  ;;  %v390_v23 = vld [vmem:[%s729_s4] ss:$0 sm:$0xff]  ;;  %s596_s4 = smov [#allocation10]  }
  0x4f   :  { %442 = vmatprep.subr.bf16.mxu1 %v593_v0  ;;  %v392_v28 = vld [vmem:[%s731_s6] ss:$0 sm:$0xff]  ;;  %s373_s6 = sshll.u32 %s596_s4, 4  ;;  %s374_s6 = int_to_ptr.vmem [resolvable:$true] %s373_s6 }
  0x50   :  { %412 = vmatmul.mubr.msk.f32.vlgmr.msra.gmra.mrb[0].mxu0 %vm92_vm1, %v82_v5  ;;  %s557_s11 = scalar_lea.vmem %s374_s6, 128  ;;  %p562_p5 = scmp.lt.s32.totalorder %s374_s6, %s374_s6 }
  0x51   :  { %433 = vmatprep.mubr.msk.f32.mxu0 %vm594_vm0, %v595_v1  ;;  %447 = vmatpush3.bf16.msra.mxu0 %v446_v20  ;;  %p558_p4 = scmp.ne.s32.totalorder %s374_s6, %s557_s11  ;;  %p563_p6 = scmp.lt.s32.totalorder %s557_s11, %s557_s11 }
  0x52   :  { %444 = vmatpush3.bf16.msra.mxu1 %v443_v11  ;;  %448 = vmatprep.subr.bf16.mxu0 %v593_v0 }
  0x53   :  { %p564_p7 = por %p563_p6, %p562_p5 }
  0x55   :  { %450 = vmatpush3.bf16.msra.mxu0 %v449_v22  ;;  %p565_p8 = pnand %p564_p7, %p558_p4 }
 0x123   :  { %v162_v13 = vpop.f32.mrb[0].mxu0 }
 0x124   :  { %v163_v14 = vadd.f32 %v388_v12, %v162_v13  ;;  %v413_v15 = vpop.f32.mrb[1].mxu0 }
 0x126   :  { %461 = vtanh.f32 %v163_v14 }
 0x130   :  { %v462_v16 = vpop.eup %461 }
 0x131   :  { %423 = vmatmul.mubr.msk.f32.vlgmr.msra.gmra.mrb[0].mxu1 %vm178_vm2, %v462_v16 }
 0x204   :  { %v248_v24 = vpop.f32.mrb[0].mxu1 }
 0x205   :  { %v249_v25 = vadd.f32 %v390_v23, %v248_v24  ;;  %v424_v26 = vpop.f32.mrb[1].mxu1 }
 0x207   :  { %463 = vtanh.f32 %v249_v25 }
 0x211   :  { %v464_v27 = vpop.eup %463 }
 0x212   :  { %434 = vmatmul.mubr.msk.f32.vlgmr.msra.gmra.mrb[2].mxu0 %vm178_vm2, %v464_v27 }
 0x2e5   :  { %v333_v29 = vpop.f32.mrb[2].mxu0 }
 0x2e6   :  { %v334_v30 = vadd.f32 %v392_v28, %v333_v29  ;;  %v435_v31 = vpop.f32.mrb[3].mxu0 }
 0x2e8   :  { %337 = vmax.xlane.f32.xlu0 %v334_v30 }
 0x375   :  { %v338_v34 = vpop.xlane.xlu0 %337 }
 0x376   :  { %v339_v35 = vsub.f32 %v334_v30, %v338_v34  ;;  %vm349_vm3 = vcmp.eq.f32.partialorder %v334_v30, %v338_v34 }
 0x377   :  { %v350_v36 = vsel %vm349_vm3, %v348_v33, 128 }
 0x378   :  { %v340_v37 = vmul.f32 1.442695, %v339_v35  ;;  %v352_v38 = vshra.s32 %v350_v36, 16  ;;  %v351_v41 = vand.u32 65535, %v350_v36 }
 0x37a   :  { %465 = vpow2.f32 %v340_v37  ;;  %v354_v39 = vcvt.s32.f32 %v352_v38  ;;  %v353_v43 = vcvt.s32.f32 %v351_v41 }
 0x37c   :  { %355 = vmin.xlane.f32.xlu0 %v354_v39 }
 0x384   :  { %v466_v40 = vpop.eup %465 }
 0x385   :  { %342 = vadd.xlane.f32.xlu1 %v466_v40 }
 0x409   :  { %v356_v42 = vpop.xlane.xlu0 %355 }
 0x40a   :  { %vm357_vm4 = vcmp.eq.f32.partialorder %v354_v39, %v356_v42 }
 0x40b   :  { %v358_v44 = vsel %vm357_vm4, %v353_v43, inf }
 0x40c   :  { %359 = vmin.xlane.f32.xlu1 %v358_v44 }
 0x412   :  { %v343_v45 = vpop.xlane.xlu1 %342 }
 0x413   :  { %467 = vrcp.f32 %v343_v45 }
 0x41d   :  { %v468_v46 = vpop.eup %467 }
 0x41e   :  { %v345_v47 = vmul.f32 %v468_v46, %v466_v40 }
 0x420   :  { %346 = vst [vmem:[#allocation10] sm:$0xff] %v345_v47 }
 0x421   :  { %568 = shalt.err (!%p565_p8)
}
 0x422   :  { %s569_s14 = scalar_lea.hbm %s732_s7, 128 }
 0x423   :  { %p570_p9 = scmp.ne.s32.totalorder %s732_s7, %s569_s14  ;;  %p573_p10 = scmp.lt.u32.totalorder %s569_s14, %s732_s7 }
 0x425   :  { %p575_p11 = pnand %p573_p10, %p570_p9 }
 0x427   :  { %578 = shalt.err (!%p575_p11)
}
 0x428   :  { %376 = dma.vmem_to_hbm [thread:$0]  %s374_s6, 128, %s732_s7, [#allocation4]   ;;  %v362_v48 = vcvt.f32.s32 %v356_v42  ;;  %vm365_vm5 = vcmask 7168  }
 0x42a   :  { %v363_v50 = vshll.u32 %v362_v48, 16 }
 0x499   :  { %v360_v49 = vpop.xlane.xlu1 %359 }
 0x49a   :  { %v361_v51 = vcvt.f32.s32 %v360_v49 }
 0x49c   :  { %v364_v52 = vadd.s32 %v363_v50, %v361_v51 }
 0x49e   :  { %366 = vst.msk [vmem:[%s733_s8] sm:$0xff] %vm365_vm5, %v364_v52 }
 0x49f   :  { %585 = dma.done.wait [#allocation4], 128  }
 0x4a0   :  { %586 = vsyncadd [#allocation4], 4294967168 }
 0x4a1   :  { %384 = vsyncpa [#allocation3], 1 }
 0x4a2   :  { %385 = vsyncpa [#allocation6], 1 }
 0x4a3   :  { %386 = vsyncpa [#allocation9], 1 }
 0x4a4   :  { %387 = vsyncpa [#allocation4], 1 }

</bundles_post_ra>
